<compile_context>
chip_gen: v7x
topology: tpu7x:2x2x1
jax: 0.10.0
libtpu: 0.0.40
codegen_flags: <defaults>
</compile_context>

<pallas_src>
import functools

import jax
import jax.numpy as jnp
import numpy as np
from jax import lax
from jax.experimental import pallas as pl
from jax.experimental.pallas import tpu as pltpu

_NEG = -1.0e30        # finite "-inf" used for masking / scratch init
_PAD_LOGIT = -1.0e9   # fill for padded vocab / label / frame positions


def _round_up(x, m):
    return (x + m - 1) // m * m


def _logaddexp(a, b):
    m = jnp.maximum(a, b)
    return m + jnp.log(jnp.exp(a - m) + jnp.exp(b - m))


def _exclusive_cumsum_lanes(x):
    """Exclusive prefix-sum along the last (lane) axis."""
    L = x.shape[-1]
    ax = x.ndim - 1
    lane = lax.broadcasted_iota(jnp.int32, x.shape, ax)
    # shift right by one lane (zero fill) -> exclusive, then Hillis-Steele scan
    y = jnp.where(lane >= 1, pltpu.roll(x, 1, ax), 0.0)
    d = 1
    while d < L:
        y = y + jnp.where(lane >= d, pltpu.roll(y, d, ax), 0.0)
        d *= 2
    return y


def _logcumsumexp_lanes(x):
    """Inclusive log-cumsum-exp along the last (lane) axis."""
    L = x.shape[-1]
    ax = x.ndim - 1
    lane = lax.broadcasted_iota(jnp.int32, x.shape, ax)
    y = x
    d = 1
    while d < L:
        y = _logaddexp(y, jnp.where(lane >= d, pltpu.roll(y, d, ax), _NEG))
        d *= 2
    return y


def _rnnt_loss_kernel(blank_idx, num_labels,
                      act_lens_ref, label_lens_ref, labels_ref,   # SMEM (prefetch)
                      logits_ref,                                 # VMEM (1, T_TILE, U1S, V1P)
                      loss_ref,                                   # VMEM (1, 8, 128)
                      lpb_ref, lpl_ref):                          # VMEM (T_pad, U1P) f32
    b = pl.program_id(0)
    ti = pl.program_id(1)
    n_t = pl.num_programs(1)
    _, t_tile, u1s, v1p = logits_ref.shape

    # ---- reset the resident scratch at the first T tile of each example ----
    @pl.when(ti == 0)
    def _():
        lpb_ref[...] = jnp.full(lpb_ref.shape, _NEG, jnp.float32)
        lpl_ref[...] = jnp.full(lpl_ref.shape, _NEG, jnp.float32)

    # ---- streaming log-softmax over the vocab axis for this T tile ----
    x = logits_ref[0].astype(jnp.float32)                     # (T_TILE, U1S, V1P)
    m = jnp.max(x, axis=-1, keepdims=True)                    # (T_TILE, U1S, 1)
    lse = m[..., 0] + jnp.log(jnp.sum(jnp.exp(x - m), axis=-1))   # (T_TILE, U1S)
    lp_blank = x[:, :, blank_idx] - lse                       # (T_TILE, U1S)

    # one-hot over the vocab built once from the SMEM label row
    sub = lax.broadcasted_iota(jnp.int32, (u1s, 1), 0)
    lab_col = jnp.zeros((u1s, 1), jnp.int32)
    for u in range(num_labels):
        lab_col = jnp.where(sub == u, labels_ref[b, u], lab_col)
    onehot = lax.broadcasted_iota(jnp.int32, (u1s, v1p), 1) == lab_col
    lp_label = jnp.sum(jnp.where(onehot[None, :, :], x, 0.0), axis=-1) - lse

    t0 = pl.multiple_of(ti * t_tile, t_tile)
    lpb_ref[pl.ds(t0, t_tile), pl.ds(0, u1s)] = lp_blank
    lpl_ref[pl.ds(t0, t_tile), pl.ds(0, u1s)] = lp_label

    # ---- alpha recursion once the whole (T, U+1) lattice has been streamed ----
    @pl.when(ti == n_t - 1)
    def _():
        t_len = act_lens_ref[b]
        u_len = label_lens_ref[b]

        # turn lp_label rows into exclusive prefix sums over u (vectorized over
        # the whole scratch, off the per-frame critical path)
        lpl_ref[...] = _exclusive_cumsum_lanes(lpl_ref[...])

        alpha0 = lpl_ref[pl.ds(0, 1), :]                 # alpha[0, u] = sum_{k<u} lp_label[0, k]
        lpb0 = lpb_ref[pl.ds(0, 1), :]
        final0 = jnp.where(t_len == 1, alpha0 + lpb0,
                           jnp.full_like(alpha0, _NEG))

        def body(t, carry):
            alpha, lpb_prev, final = carry
            lpb_cur = lpb_ref[pl.ds(t, 1), :]            # (1, U1P)
            p_row = lpl_ref[pl.ds(t, 1), :]              # (1, U1P) prefix sums
            # alpha[t, u] = P[u] + logcumsumexp_{k<=u}(alpha[t-1,k] + lpb[t-1,k] - P[k])
            z = (alpha + lpb_prev) - p_row
            alpha_new = p_row + _logcumsumexp_lanes(z)
            final = jnp.where(t == t_len - 1, alpha_new + lpb_cur, final)
            return alpha_new, lpb_cur, final

        _, _, final = lax.fori_loop(1, t_len, body, (alpha0, lpb0, final0))

        lane = lax.broadcasted_iota(jnp.int32, final.shape, 1)
        loss_val = -jnp.sum(jnp.where(lane == u_len, final, 0.0))
        loss_ref[...] = jnp.zeros(loss_ref.shape, jnp.float32) + loss_val


@functools.partial(jax.jit, static_argnames=("blank_idx", "t_tile"))
def rnnt_loss(logits, logit_lens, y, y_lens, blank_idx=0, t_tile=None):
    """JAX/Pallas equivalent of RNNTLoss.forward (mean reduction)."""
    y = y.astype(jnp.int32)
    logit_lens = logit_lens.astype(jnp.int32)
    y_lens = y_lens.astype(jnp.int32)

    B, T, U1, V1 = logits.shape
    U = U1 - 1
    assert y.shape == (B, U)

    # lane / sublane dense padding
    V1P = _round_up(V1, 128)
    U1S = _round_up(U1, 8)
    U1P = _round_up(U1, 128)

    itemsize = jnp.dtype(logits.dtype).itemsize
    if t_tile is None:
        # size the T tile so (double-buffered input + ~6 f32 temporaries + the
        # resident scratch) stays well inside every generation's VMEM
        row_in = U1S * V1P * itemsize
        row_f32 = U1S * V1P * 4
        scratch_bytes = 2 * _round_up(T, 8) * U1P * 4
        budget = 20 * 1024 * 1024 - scratch_bytes
        t_tile = max(1, min(T, budget // (2 * row_in + 6 * row_f32)))
        if t_tile >= 8:
            t_tile = (t_tile // 8) * 8
        t_tile = int(min(t_tile, 256))
    else:
        t_tile = int(max(1, min(t_tile, T)))

    T_pad = _round_up(T, t_tile)
    n_t = T_pad // t_tile

    logits_p = jnp.pad(
        logits,
        ((0, 0), (0, T_pad - T), (0, U1S - U1), (0, V1P - V1)),
        constant_values=_PAD_LOGIT)

    kernel = functools.partial(_rnnt_loss_kernel, blank_idx, U)

    cost = pl.CostEstimate(
        flops=6 * B * T_pad * U1S * V1P,
        transcendentals=B * T_pad * U1S * V1P,
        bytes_accessed=int(logits_p.size) * itemsize + B * T_pad * U1P * 8)

    out = pl.pallas_call(
        kernel,
        out_shape=jax.ShapeDtypeStruct((B, 8, 128), jnp.float32),
        grid_spec=pltpu.PrefetchScalarGridSpec(
            num_scalar_prefetch=3,
            grid=(B, n_t),
            in_specs=[pl.BlockSpec((1, t_tile, U1S, V1P),
                                   lambda b, t, al, ll, lab: (b, t, 0, 0))],
            out_specs=pl.BlockSpec((1, 8, 128),
                                   lambda b, t, al, ll, lab: (b, 0, 0)),
            scratch_shapes=[pltpu.VMEM((T_pad, U1P), jnp.float32),
                            pltpu.VMEM((T_pad, U1P), jnp.float32)],
        ),
        compiler_params=pltpu.CompilerParams(
            dimension_semantics=("parallel", "arbitrary"),
            vmem_limit_bytes=48 * 1024 * 1024),
        cost_estimate=cost,
    )(logit_lens, y_lens, y, logits_p)

    per_example = out[:, 0, 0]
    # warprnnt_pytorch.RNNTLoss default reduction is 'mean'
    return jnp.mean(per_example)


def _rnnt_loss_ref(logits, logit_lens, y, y_lens, blank):
    """Pure NumPy reference (float64) for verification."""
    logits = np.asarray(logits, dtype=np.float64)
    B, T, U1, V1 = logits.shape
    mx = logits.max(-1, keepdims=True)
    lp = logits - (mx + np.log(np.sum(np.exp(logits - mx), -1, keepdims=True)))
    losses = []
    for b in range(B):
        Tb = int(logit_lens[b])
        Ub = int(y_lens[b])
        alpha = np.zeros((Tb, Ub + 1), dtype=np.float64)
        for t in range(1, Tb):
            alpha[t, 0] = alpha[t - 1, 0] + lp[b, t - 1, 0, blank]
        for u in range(1, Ub + 1):
            alpha[0, u] = alpha[0, u - 1] + lp[b, 0, u - 1, int(y[b, u - 1])]
        for t in range(1, Tb):
            for u in range(1, Ub + 1):
                no_emit = alpha[t - 1, u] + lp[b, t - 1, u, blank]
                emit = alpha[t, u - 1] + lp[b, t, u - 1, int(y[b, u - 1])]
                alpha[t, u] = np.logaddexp(no_emit, emit)
        losses.append(-(alpha[Tb - 1, Ub] + lp[b, Tb - 1, Ub, blank]))
    return float(np.mean(losses))


if __name__ == "__main__":
    key = jax.random.PRNGKey(0)
    blank_idx = 0

    # --- test 1: single T tile ---
    B, T, U, V1 = 2, 8, 4, 16
    k1, k2, k3, k4 = jax.random.split(key, 4)
    logits = jax.random.normal(k1, (B, T, U + 1, V1), dtype=jnp.float32)
    y = jax.random.randint(k2, (B, U), 1, V1, dtype=jnp.int32)   # never blank
    logit_lens = jnp.array([T, T - 2], dtype=jnp.int32)
    y_lens = jnp.array([U, U - 1], dtype=jnp.int32)

    loss = rnnt_loss(logits, logit_lens, y, y_lens, blank_idx=blank_idx)
    loss = jax.block_until_ready(loss)
    ref = _rnnt_loss_ref(np.asarray(logits), np.asarray(logit_lens),
                         np.asarray(y), np.asarray(y_lens), blank_idx)
    assert abs(float(loss) - ref) < 1e-3 * max(1.0, abs(ref)), (float(loss), ref)

    # --- test 2: multiple T tiles, ragged lengths (incl. T_b=1, U_b=0 edges) ---
    B2, T2, U2, V12 = 3, 19, 6, 33
    logits2 = jax.random.normal(k3, (B2, T2, U2 + 1, V12), dtype=jnp.float32) * 2.0
    y2 = jax.random.randint(k4, (B2, U2), 1, V12, dtype=jnp.int32)
    logit_lens2 = jnp.array([T2, 11, 1], dtype=jnp.int32)
    y_lens2 = jnp.array([U2, 3, 0], dtype=jnp.int32)

    loss2 = rnnt_loss(logits2, logit_lens2, y2, y_lens2,
                      blank_idx=blank_idx, t_tile=8)
    loss2 = jax.block_until_ready(loss2)
    ref2 = _rnnt_loss_ref(np.asarray(logits2), np.asarray(logit_lens2),
                          np.asarray(y2), np.asarray(y_lens2), blank_idx)
    assert abs(float(loss2) - ref2) < 1e-3 * max(1.0, abs(ref2)), (float(loss2), ref2)

    print("KERNEL_OK")
</pallas_src>

<mosaic_0001>
module attributes {stable_mosaic.version = 11 : i64} {
  func.func @_rnnt_loss_kernel(%arg0: i32, %arg1: i32, %arg2: memref<2xi32, #tpu.memory_space<smem>>, %arg3: memref<2xi32, #tpu.memory_space<smem>>, %arg4: memref<2x4xi32, #tpu.memory_space<smem>>, %arg5: memref<1x8x8x128xf32, #tpu.memory_space<vmem>>, %arg6: memref<1x8x128xf32, #tpu.memory_space<vmem>>, %arg7: memref<8x128xf32, #tpu.memory_space<vmem>>, %arg8: memref<8x128xf32, #tpu.memory_space<vmem>>) attributes {dimension_semantics = [#tpu.dimension_semantics<parallel>, #tpu.dimension_semantics<arbitrary>], iteration_bounds = array<i64: 2, 1>, scalar_prefetch = 3 : i64, scratch_operands = 2 : i64, tpu.core_type = #tpu.core_type<tc>, window_params = [{transform_indices = @transform_0, window_bounds = array<i64: 1, 8, 8, 128>}, {transform_indices = @transform_1, window_bounds = array<i64: 1, 8, 128>}]} {
    %c0_i32 = arith.constant 0 : i32
    %0 = arith.cmpi eq, %arg1, %c0_i32 : i32
    %1 = arith.extui %0 : i1 to i32
    %c0_i32_0 = arith.constant 0 : i32
    %2 = arith.cmpi ne, %1, %c0_i32_0 : i32
    scf.if %2 {
      %cst_14 = arith.constant -1.000000e+30 : f32
      %62 = vector.broadcast %cst_14 : f32 to vector<8x128xf32>
      %c0_15 = arith.constant 0 : index
      %c0_16 = arith.constant 0 : index
      %63 = vector.load %arg7[%c0_15, %c0_16] : memref<8x128xf32, #tpu.memory_space<vmem>>, vector<8x128xf32>
      tpu.vector_store %arg7[%c0_15, %c0_16], %62 {strides = array<i32>} : memref<8x128xf32, #tpu.memory_space<vmem>>, vector<8x128xf32>,
      %cst_17 = arith.constant -1.000000e+30 : f32
      %64 = vector.broadcast %cst_17 : f32 to vector<8x128xf32>
      %c0_18 = arith.constant 0 : index
      %c0_19 = arith.constant 0 : index
      %65 = vector.load %arg8[%c0_18, %c0_19] : memref<8x128xf32, #tpu.memory_space<vmem>>, vector<8x128xf32>
      tpu.vector_store %arg8[%c0_18, %c0_19], %64 {strides = array<i32>} : memref<8x128xf32, #tpu.memory_space<vmem>>, vector<8x128xf32>,
    } else {
    }
    %c0 = arith.constant 0 : index
    %c0_1 = arith.constant 0 : index
    %c0_2 = arith.constant 0 : index
    %c0_3 = arith.constant 0 : index
    %3 = vector.load %arg5[%c0, %c0_1, %c0_2, %c0_3] : memref<1x8x8x128xf32, #tpu.memory_space<vmem>>, vector<1x8x8x128xf32>
    %4 = vector.shape_cast %3 : vector<1x8x8x128xf32> to vector<8x8x128xf32>
    %cst = arith.constant dense<0xFF800000> : vector<8x8xf32>
    %5 = vector.multi_reduction <maximumf>, %4, %cst [2] : vector<8x8x128xf32> to vector<8x8xf32>
    %6 = vector.shape_cast %5 : vector<8x8xf32> to vector<8x8x1xf32>
    %7 = vector.shape_cast %6 : vector<8x8x1xf32> to vector<8x8xf32>
    %8 = vector.broadcast %6 : vector<8x8x1xf32> to vector<8x8x128xf32>
    %9 = arith.subf %4, %8 : vector<8x8x128xf32>
    %10 = math.exp %9 : vector<8x8x128xf32>
    %cst_4 = arith.constant dense<0.000000e+00> : vector<8x8xf32>
    %11 = vector.multi_reduction <add>, %10, %cst_4 [2] : vector<8x8x128xf32> to vector<8x8xf32>
    %12 = math.log %11 : vector<8x8xf32>
    %13 = arith.addf %7, %12 : vector<8x8xf32>
    %14 = vector.extract_strided_slice %4 {offsets = [0, 0, 0], sizes = [8, 8, 1], strides = [1, 1, 1]} : vector<8x8x128xf32> to vector<8x8x1xf32>
    %15 = vector.shape_cast %14 : vector<8x8x1xf32> to vector<8x8xf32>
    %16 = arith.subf %15, %13 : vector<8x8xf32>
    %17 = tpu.iota {dimensions = array<i32: 0>} : vector<8x1xi32>
    %c0_i32_5 = arith.constant 0 : i32
    %18 = vector.broadcast %c0_i32_5 : i32 to vector<8x1xi32>
    %c0_i32_6 = arith.constant 0 : i32
    %19 = vector.broadcast %c0_i32_6 : i32 to vector<8x1xi32>
    %20 = arith.cmpi eq, %17, %19 : vector<8x1xi32>
    %21 = arith.index_cast %arg0 : i32 to index
    %c0_7 = arith.constant 0 : index
    %22 = memref.load %arg4[%21, %c0_7] : memref<2x4xi32, #tpu.memory_space<smem>>
    %23 = vector.broadcast %22 : i32 to vector<8x1xi32>
    %24 = arith.select %20, %23, %18 : vector<8x1xi1>, vector<8x1xi32>
    %c1_i32 = arith.constant 1 : i32
    %25 = vector.broadcast %c1_i32 : i32 to vector<8x1xi32>
    %26 = arith.cmpi eq, %17, %25 : vector<8x1xi32>
    %27 = arith.index_cast %arg0 : i32 to index
    %c1 = arith.constant 1 : index
    %28 = memref.load %arg4[%27, %c1] : memref<2x4xi32, #tpu.memory_space<smem>>
    %29 = vector.broadcast %28 : i32 to vector<8x1xi32>
    %30 = arith.select %26, %29, %24 : vector<8x1xi1>, vector<8x1xi32>
    %c2_i32 = arith.constant 2 : i32
    %31 = vector.broadcast %c2_i32 : i32 to vector<8x1xi32>
    %32 = arith.cmpi eq, %17, %31 : vector<8x1xi32>
    %33 = arith.index_cast %arg0 : i32 to index
    %c2 = arith.constant 2 : index
    %34 = memref.load %arg4[%33, %c2] : memref<2x4xi32, #tpu.memory_space<smem>>
    %35 = vector.broadcast %34 : i32 to vector<8x1xi32>
    %36 = arith.select %32, %35, %30 : vector<8x1xi1>, vector<8x1xi32>
    %c3_i32 = arith.constant 3 : i32
    %37 = vector.broadcast %c3_i32 : i32 to vector<8x1xi32>
    %38 = arith.cmpi eq, %17, %37 : vector<8x1xi32>
    %39 = arith.index_cast %arg0 : i32 to index
    %c3 = arith.constant 3 : index
    %40 = memref.load %arg4[%39, %c3] : memref<2x4xi32, #tpu.memory_space<smem>>
    %41 = vector.broadcast %40 : i32 to vector<8x1xi32>
    %42 = arith.select %38, %41, %36 : vector<8x1xi1>, vector<8x1xi32>
    %43 = tpu.iota {dimensions = array<i32: 1>} : vector<8x128xi32>
    %44 = vector.broadcast %42 : vector<8x1xi32> to vector<8x128xi32>
    %45 = arith.cmpi eq, %43, %44 : vector<8x128xi32>
    %46 = vector.shape_cast %45 : vector<8x128xi1> to vector<1x8x128xi1>
    %cst_8 = arith.constant 0.000000e+00 : f32
    %47 = vector.shape_cast %46 : vector<1x8x128xi1> to vector<1x8x128xi1>
    %48 = vector.broadcast %47 : vector<1x8x128xi1> to vector<8x8x128xi1>
    %49 = vector.broadcast %cst_8 : f32 to vector<8x8x128xf32>
    %50 = arith.select %48, %4, %49 : vector<8x8x128xi1>, vector<8x8x128xf32>
    %cst_9 = arith.constant dense<0.000000e+00> : vector<8x8xf32>
    %51 = vector.multi_reduction <add>, %50, %cst_9 [2] : vector<8x8x128xf32> to vector<8x8xf32>
    %52 = arith.subf %51, %13 : vector<8x8xf32>
    %c8_i32 = arith.constant 8 : i32
    %53 = arith.muli %arg1, %c8_i32 : i32
    %54 = tpu.assume_multiple %53, 8 : i32
    %55 = arith.index_cast %54 : i32 to index
    %c0_10 = arith.constant 0 : index
    %56 = vector.load %arg7[%55, %c0_10] : memref<8x128xf32, #tpu.memory_space<vmem>>, vector<8x8xf32>
    tpu.vector_store %arg7[%55, %c0_10], %16 {strides = array<i32>} : memref<8x128xf32, #tpu.memory_space<vmem>>, vector<8x8xf32>,
    %57 = arith.index_cast %54 : i32 to index
    %c0_11 = arith.constant 0 : index
    %58 = vector.load %arg8[%57, %c0_11] : memref<8x128xf32, #tpu.memory_space<vmem>>, vector<8x8xf32>
    tpu.vector_store %arg8[%57, %c0_11], %52 {strides = array<i32>} : memref<8x128xf32, #tpu.memory_space<vmem>>, vector<8x8xf32>,
    %c0_i32_12 = arith.constant 0 : i32
    %59 = arith.cmpi eq, %arg1, %c0_i32_12 : i32
    %60 = arith.extui %59 : i1 to i32
    %c0_i32_13 = arith.constant 0 : i32
    %61 = arith.cmpi ne, %60, %c0_i32_13 : i32
    scf.if %61 {
      %62 = arith.index_cast %arg0 : i32 to index
      %63 = memref.load %arg2[%62] : memref<2xi32, #tpu.memory_space<smem>>
      %64 = arith.index_cast %arg0 : i32 to index
      %65 = memref.load %arg3[%64] : memref<2xi32, #tpu.memory_space<smem>>
      %c0_14 = arith.constant 0 : index
      %c0_15 = arith.constant 0 : index
      %66 = vector.load %arg8[%c0_14, %c0_15] : memref<8x128xf32, #tpu.memory_space<vmem>>, vector<8x128xf32>
      %67 = tpu.iota {dimensions = array<i32: 1>} : vector<8x128xi32>
      %c1_i32_16 = arith.constant 1 : i32
      %68 = vector.broadcast %c1_i32_16 : i32 to vector<8x128xi32>
      %69 = arith.cmpi sge, %67, %68 : vector<8x128xi32>
      %c1_i32_17 = arith.constant 1 : i32
      %70 = tpu.dynamic_rotate %66 by %c1_i32_17 dim 1 : vector<8x128xf32>, i32 -> vector<8x128xf32>
      %cst_18 = arith.constant 0.000000e+00 : f32
      %71 = vector.broadcast %cst_18 : f32 to vector<8x128xf32>
      %72 = arith.select %69, %70, %71 : vector<8x128xi1>, vector<8x128xf32>
      %c1_i32_19 = arith.constant 1 : i32
      %73 = vector.broadcast %c1_i32_19 : i32 to vector<8x128xi32>
      %74 = arith.cmpi sge, %67, %73 : vector<8x128xi32>
      %c1_i32_20 = arith.constant 1 : i32
      %75 = tpu.dynamic_rotate %72 by %c1_i32_20 dim 1 : vector<8x128xf32>, i32 -> vector<8x128xf32>
      %cst_21 = arith.constant 0.000000e+00 : f32
      %76 = vector.broadcast %cst_21 : f32 to vector<8x128xf32>
      %77 = arith.select %74, %75, %76 : vector<8x128xi1>, vector<8x128xf32>
      %78 = arith.addf %72, %77 : vector<8x128xf32>
      %c2_i32_22 = arith.constant 2 : i32
      %79 = vector.broadcast %c2_i32_22 : i32 to vector<8x128xi32>
      %80 = arith.cmpi sge, %67, %79 : vector<8x128xi32>
      %c2_i32_23 = arith.constant 2 : i32
      %81 = tpu.dynamic_rotate %78 by %c2_i32_23 dim 1 : vector<8x128xf32>, i32 -> vector<8x128xf32>
      %cst_24 = arith.constant 0.000000e+00 : f32
      %82 = vector.broadcast %cst_24 : f32 to vector<8x128xf32>
      %83 = arith.select %80, %81, %82 : vector<8x128xi1>, vector<8x128xf32>
      %84 = arith.addf %78, %83 : vector<8x128xf32>
      %c4_i32 = arith.constant 4 : i32
      %85 = vector.broadcast %c4_i32 : i32 to vector<8x128xi32>
      %86 = arith.cmpi sge, %67, %85 : vector<8x128xi32>
      %c4_i32_25 = arith.constant 4 : i32
      %87 = tpu.dynamic_rotate %84 by %c4_i32_25 dim 1 : vector<8x128xf32>, i32 -> vector<8x128xf32>
      %cst_26 = arith.constant 0.000000e+00 : f32
      %88 = vector.broadcast %cst_26 : f32 to vector<8x128xf32>
      %89 = arith.select %86, %87, %88 : vector<8x128xi1>, vector<8x128xf32>
      %90 = arith.addf %84, %89 : vector<8x128xf32>
      %c8_i32_27 = arith.constant 8 : i32
      %91 = vector.broadcast %c8_i32_27 : i32 to vector<8x128xi32>
      %92 = arith.cmpi sge, %67, %91 : vector<8x128xi32>
      %c8_i32_28 = arith.constant 8 : i32
      %93 = tpu.dynamic_rotate %90 by %c8_i32_28 dim 1 : vector<8x128xf32>, i32 -> vector<8x128xf32>
      %cst_29 = arith.constant 0.000000e+00 : f32
      %94 = vector.broadcast %cst_29 : f32 to vector<8x128xf32>
      %95 = arith.select %92, %93, %94 : vector<8x128xi1>, vector<8x128xf32>
      %96 = arith.addf %90, %95 : vector<8x128xf32>
      %c16_i32 = arith.constant 16 : i32
      %97 = vector.broadcast %c16_i32 : i32 to vector<8x128xi32>
      %98 = arith.cmpi sge, %67, %97 : vector<8x128xi32>
      %c16_i32_30 = arith.constant 16 : i32
      %99 = tpu.dynamic_rotate %96 by %c16_i32_30 dim 1 : vector<8x128xf32>, i32 -> vector<8x128xf32>
      %cst_31 = arith.constant 0.000000e+00 : f32
      %100 = vector.broadcast %cst_31 : f32 to vector<8x128xf32>
      %101 = arith.select %98, %99, %100 : vector<8x128xi1>, vector<8x128xf32>
      %102 = arith.addf %96, %101 : vector<8x128xf32>
      %c32_i32 = arith.constant 32 : i32
      %103 = vector.broadcast %c32_i32 : i32 to vector<8x128xi32>
      %104 = arith.cmpi sge, %67, %103 : vector<8x128xi32>
      %c32_i32_32 = arith.constant 32 : i32
      %105 = tpu.dynamic_rotate %102 by %c32_i32_32 dim 1 : vector<8x128xf32>, i32 -> vector<8x128xf32>
      %cst_33 = arith.constant 0.000000e+00 : f32
      %106 = vector.broadcast %cst_33 : f32 to vector<8x128xf32>
      %107 = arith.select %104, %105, %106 : vector<8x128xi1>, vector<8x128xf32>
      %108 = arith.addf %102, %107 : vector<8x128xf32>
      %c64_i32 = arith.constant 64 : i32
      %109 = vector.broadcast %c64_i32 : i32 to vector<8x128xi32>
      %110 = arith.cmpi sge, %67, %109 : vector<8x128xi32>
      %c64_i32_34 = arith.constant 64 : i32
      %111 = tpu.dynamic_rotate %108 by %c64_i32_34 dim 1 : vector<8x128xf32>, i32 -> vector<8x128xf32>
      %cst_35 = arith.constant 0.000000e+00 : f32
      %112 = vector.broadcast %cst_35 : f32 to vector<8x128xf32>
      %113 = arith.select %110, %111, %112 : vector<8x128xi1>, vector<8x128xf32>
      %114 = arith.addf %108, %113 : vector<8x128xf32>
      %c0_36 = arith.constant 0 : index
      %c0_37 = arith.constant 0 : index
      %115 = vector.load %arg8[%c0_36, %c0_37] : memref<8x128xf32, #tpu.memory_space<vmem>>, vector<8x128xf32>
      tpu.vector_store %arg8[%c0_36, %c0_37], %114 {strides = array<i32>} : memref<8x128xf32, #tpu.memory_space<vmem>>, vector<8x128xf32>,
      %c0_38 = arith.constant 0 : index
      %c0_39 = arith.constant 0 : index
      %116 = vector.load %arg8[%c0_38, %c0_39] : memref<8x128xf32, #tpu.memory_space<vmem>>, vector<1x128xf32>
      %c0_40 = arith.constant 0 : index
      %c0_41 = arith.constant 0 : index
      %117 = vector.load %arg7[%c0_40, %c0_41] : memref<8x128xf32, #tpu.memory_space<vmem>>, vector<1x128xf32>
      %c1_i32_42 = arith.constant 1 : i32
      %118 = arith.cmpi eq, %63, %c1_i32_42 : i32
      %119 = arith.addf %116, %117 : vector<1x128xf32>
      %cst_43 = arith.constant -1.000000e+30 : f32
      %120 = vector.broadcast %cst_43 : f32 to vector<1x128xf32>
      %121 = arith.select %118, %119, %120 : vector<1x128xf32>
      %c1_i32_44 = arith.constant 1 : i32
      %122 = arith.subi %63, %c1_i32_44 : i32
      %123 = arith.addi %c1_i32_44, %122 : i32
      %c1_i32_45 = arith.constant 1 : i32
      %124:3 = scf.for %arg9 = %c1_i32_44 to %123 step %c1_i32_45 iter_args(%arg10 = %116, %arg11 = %117, %arg12 = %121) -> (vector<1x128xf32>, vector<1x128xf32>, vector<1x128xf32>)  : i32 {
        %139 = arith.index_cast %arg9 : i32 to index
        %c0_53 = arith.constant 0 : index
        %140 = vector.load %arg7[%139, %c0_53] : memref<8x128xf32, #tpu.memory_space<vmem>>, vector<1x128xf32>
        %141 = arith.index_cast %arg9 : i32 to index
        %c0_54 = arith.constant 0 : index
        %142 = vector.load %arg8[%141, %c0_54] : memref<8x128xf32, #tpu.memory_space<vmem>>, vector<1x128xf32>
        %143 = arith.addf %arg10, %arg11 : vector<1x128xf32>
        %144 = arith.subf %143, %142 : vector<1x128xf32>
        %145 = tpu.iota {dimensions = array<i32: 1>} : vector<1x128xi32>
        %c1_i32_55 = arith.constant 1 : i32
        %146 = vector.broadcast %c1_i32_55 : i32 to vector<1x128xi32>
        %147 = arith.cmpi sge, %145, %146 : vector<1x128xi32>
        %c1_i32_56 = arith.constant 1 : i32
        %148 = tpu.dynamic_rotate %144 by %c1_i32_56 dim 1 : vector<1x128xf32>, i32 -> vector<1x128xf32>
        %cst_57 = arith.constant -1.000000e+30 : f32
        %149 = vector.broadcast %cst_57 : f32 to vector<1x128xf32>
        %150 = arith.select %147, %148, %149 : vector<1x128xi1>, vector<1x128xf32>
        %151 = arith.maximumf %144, %150 : vector<1x128xf32>
        %152 = arith.subf %144, %151 : vector<1x128xf32>
        %153 = math.exp %152 : vector<1x128xf32>
        %154 = arith.subf %150, %151 : vector<1x128xf32>
        %155 = math.exp %154 : vector<1x128xf32>
        %156 = arith.addf %153, %155 : vector<1x128xf32>
        %157 = math.log %156 : vector<1x128xf32>
        %158 = arith.addf %151, %157 : vector<1x128xf32>
        %c2_i32_58 = arith.constant 2 : i32
        %159 = vector.broadcast %c2_i32_58 : i32 to vector<1x128xi32>
        %160 = arith.cmpi sge, %145, %159 : vector<1x128xi32>
        %c2_i32_59 = arith.constant 2 : i32
        %161 = tpu.dynamic_rotate %158 by %c2_i32_59 dim 1 : vector<1x128xf32>, i32 -> vector<1x128xf32>
        %cst_60 = arith.constant -1.000000e+30 : f32
        %162 = vector.broadcast %cst_60 : f32 to vector<1x128xf32>
        %163 = arith.select %160, %161, %162 : vector<1x128xi1>, vector<1x128xf32>
        %164 = arith.maximumf %158, %163 : vector<1x128xf32>
        %165 = arith.subf %158, %164 : vector<1x128xf32>
        %166 = math.exp %165 : vector<1x128xf32>
        %167 = arith.subf %163, %164 : vector<1x128xf32>
        %168 = math.exp %167 : vector<1x128xf32>
        %169 = arith.addf %166, %168 : vector<1x128xf32>
        %170 = math.log %169 : vector<1x128xf32>
        %171 = arith.addf %164, %170 : vector<1x128xf32>
        %c4_i32_61 = arith.constant 4 : i32
        %172 = vector.broadcast %c4_i32_61 : i32 to vector<1x128xi32>
        %173 = arith.cmpi sge, %145, %172 : vector<1x128xi32>
        %c4_i32_62 = arith.constant 4 : i32
        %174 = tpu.dynamic_rotate %171 by %c4_i32_62 dim 1 : vector<1x128xf32>, i32 -> vector<1x128xf32>
        %cst_63 = arith.constant -1.000000e+30 : f32
        %175 = vector.broadcast %cst_63 : f32 to vector<1x128xf32>
        %176 = arith.select %173, %174, %175 : vector<1x128xi1>, vector<1x128xf32>
        %177 = arith.maximumf %171, %176 : vector<1x128xf32>
        %178 = arith.subf %171, %177 : vector<1x128xf32>
        %179 = math.exp %178 : vector<1x128xf32>
        %180 = arith.subf %176, %177 : vector<1x128xf32>
        %181 = math.exp %180 : vector<1x128xf32>
        %182 = arith.addf %179, %181 : vector<1x128xf32>
        %183 = math.log %182 : vector<1x128xf32>
        %184 = arith.addf %177, %183 : vector<1x128xf32>
        %c8_i32_64 = arith.constant 8 : i32
        %185 = vector.broadcast %c8_i32_64 : i32 to vector<1x128xi32>
        %186 = arith.cmpi sge, %145, %185 : vector<1x128xi32>
        %c8_i32_65 = arith.constant 8 : i32
        %187 = tpu.dynamic_rotate %184 by %c8_i32_65 dim 1 : vector<1x128xf32>, i32 -> vector<1x128xf32>
        %cst_66 = arith.constant -1.000000e+30 : f32
        %188 = vector.broadcast %cst_66 : f32 to vector<1x128xf32>
        %189 = arith.select %186, %187, %188 : vector<1x128xi1>, vector<1x128xf32>
        %190 = arith.maximumf %184, %189 : vector<1x128xf32>
        %191 = arith.subf %184, %190 : vector<1x128xf32>
        %192 = math.exp %191 : vector<1x128xf32>
        %193 = arith.subf %189, %190 : vector<1x128xf32>
        %194 = math.exp %193 : vector<1x128xf32>
        %195 = arith.addf %192, %194 : vector<1x128xf32>
        %196 = math.log %195 : vector<1x128xf32>
        %197 = arith.addf %190, %196 : vector<1x128xf32>
        %c16_i32_67 = arith.constant 16 : i32
        %198 = vector.broadcast %c16_i32_67 : i32 to vector<1x128xi32>
        %199 = arith.cmpi sge, %145, %198 : vector<1x128xi32>
        %c16_i32_68 = arith.constant 16 : i32
        %200 = tpu.dynamic_rotate %197 by %c16_i32_68 dim 1 : vector<1x128xf32>, i32 -> vector<1x128xf32>
        %cst_69 = arith.constant -1.000000e+30 : f32
        %201 = vector.broadcast %cst_69 : f32 to vector<1x128xf32>
        %202 = arith.select %199, %200, %201 : vector<1x128xi1>, vector<1x128xf32>
        %203 = arith.maximumf %197, %202 : vector<1x128xf32>
        %204 = arith.subf %197, %203 : vector<1x128xf32>
        %205 = math.exp %204 : vector<1x128xf32>
        %206 = arith.subf %202, %203 : vector<1x128xf32>
        %207 = math.exp %206 : vector<1x128xf32>
        %208 = arith.addf %205, %207 : vector<1x128xf32>
        %209 = math.log %208 : vector<1x128xf32>
        %210 = arith.addf %203, %209 : vector<1x128xf32>
        %c32_i32_70 = arith.constant 32 : i32
        %211 = vector.broadcast %c32_i32_70 : i32 to vector<1x128xi32>
        %212 = arith.cmpi sge, %145, %211 : vector<1x128xi32>
        %c32_i32_71 = arith.constant 32 : i32
        %213 = tpu.dynamic_rotate %210 by %c32_i32_71 dim 1 : vector<1x128xf32>, i32 -> vector<1x128xf32>
        %cst_72 = arith.constant -1.000000e+30 : f32
        %214 = vector.broadcast %cst_72 : f32 to vector<1x128xf32>
        %215 = arith.select %212, %213, %214 : vector<1x128xi1>, vector<1x128xf32>
        %216 = arith.maximumf %210, %215 : vector<1x128xf32>
        %217 = arith.subf %210, %216 : vector<1x128xf32>
        %218 = math.exp %217 : vector<1x128xf32>
        %219 = arith.subf %215, %216 : vector<1x128xf32>
        %220 = math.exp %219 : vector<1x128xf32>
        %221 = arith.addf %218, %220 : vector<1x128xf32>
        %222 = math.log %221 : vector<1x128xf32>
        %223 = arith.addf %216, %222 : vector<1x128xf32>
        %c64_i32_73 = arith.constant 64 : i32
        %224 = vector.broadcast %c64_i32_73 : i32 to vector<1x128xi32>
        %225 = arith.cmpi sge, %145, %224 : vector<1x128xi32>
        %c64_i32_74 = arith.constant 64 : i32
        %226 = tpu.dynamic_rotate %223 by %c64_i32_74 dim 1 : vector<1x128xf32>, i32 -> vector<1x128xf32>
        %cst_75 = arith.constant -1.000000e+30 : f32
        %227 = vector.broadcast %cst_75 : f32 to vector<1x128xf32>
        %228 = arith.select %225, %226, %227 : vector<1x128xi1>, vector<1x128xf32>
        %229 = arith.maximumf %223, %228 : vector<1x128xf32>
        %230 = arith.subf %223, %229 : vector<1x128xf32>
        %231 = math.exp %230 : vector<1x128xf32>
        %232 = arith.subf %228, %229 : vector<1x128xf32>
        %233 = math.exp %232 : vector<1x128xf32>
        %234 = arith.addf %231, %233 : vector<1x128xf32>
        %235 = math.log %234 : vector<1x128xf32>
        %236 = arith.addf %229, %235 : vector<1x128xf32>
        %237 = arith.addf %142, %236 : vector<1x128xf32>
        %c1_i32_76 = arith.constant 1 : i32
        %238 = arith.subi %63, %c1_i32_76 : i32
        %239 = arith.cmpi eq, %arg9, %238 : i32
        %240 = arith.addf %237, %140 : vector<1x128xf32>
        %241 = arith.select %239, %240, %arg12 : vector<1x128xf32>
        scf.yield %237, %140, %241 : vector<1x128xf32>, vector<1x128xf32>, vector<1x128xf32>
      }
      %125 = tpu.iota {dimensions = array<i32: 1>} : vector<1x128xi32>
      %126 = vector.broadcast %65 : i32 to vector<1x128xi32>
      %127 = arith.cmpi eq, %125, %126 : vector<1x128xi32>
      %cst_46 = arith.constant 0.000000e+00 : f32
      %128 = vector.broadcast %cst_46 : f32 to vector<1x128xf32>
      %129 = arith.select %127, %124#2, %128 : vector<1x128xi1>, vector<1x128xf32>
      %130 = vector.shape_cast %129 : vector<1x128xf32> to vector<1x1x128xf32>
      %cst_47 = arith.constant dense<0.000000e+00> : vector<1xf32>
      %131 = vector.multi_reduction <add>, %130, %cst_47 [1, 2] : vector<1x1x128xf32> to vector<1xf32>
      %132 = vector.shape_cast %131 : vector<1xf32> to vector<1x1x1xf32>
      %133 = vector.extract %132[0, 0, 0] : f32 from vector<1x1x1xf32>
      %cst_48 = arith.constant 0.000000e+00 : f32
      %134 = arith.subf %cst_48, %133 : f32
      %cst_49 = arith.constant 0.000000e+00 : f32
      %135 = vector.broadcast %cst_49 : f32 to vector<1x8x128xf32>
      %136 = vector.broadcast %134 : f32 to vector<1x8x128xf32>
      %137 = arith.addf %135, %136 : vector<1x8x128xf32>
      %c0_50 = arith.constant 0 : index
      %c0_51 = arith.constant 0 : index
      %c0_52 = arith.constant 0 : index
      %138 = vector.load %arg6[%c0_50, %c0_51, %c0_52] : memref<1x8x128xf32, #tpu.memory_space<vmem>>, vector<1x8x128xf32>
      tpu.vector_store %arg6[%c0_50, %c0_51, %c0_52], %137 {strides = array<i32>} : memref<1x8x128xf32, #tpu.memory_space<vmem>>, vector<1x8x128xf32>,
    } else {
    }
    return
  }
  func.func @transform_0(%arg0: i32, %arg1: i32, %arg2: memref<2xi32, #tpu.memory_space<smem>>, %arg3: memref<2xi32, #tpu.memory_space<smem>>, %arg4: memref<2x4xi32, #tpu.memory_space<smem>>) -> (i32, i32, i32, i32) {
    %c0_i32 = arith.constant 0 : i32
    %c0_i32_0 = arith.constant 0 : i32
    %c0_i32_1 = arith.constant 0 : i32
    return %arg0, %arg1, %c0_i32, %c0_i32_0 : i32, i32, i32, i32
  }
  func.func @transform_1(%arg0: i32, %arg1: i32, %arg2: memref<2xi32, #tpu.memory_space<smem>>, %arg3: memref<2xi32, #tpu.memory_space<smem>>, %arg4: memref<2x4xi32, #tpu.memory_space<smem>>) -> (i32, i32, i32) {
    %c0_i32 = arith.constant 0 : i32
    %c0_i32_0 = arith.constant 0 : i32
    %c0_i32_1 = arith.constant 0 : i32
    return %arg0, %c0_i32, %c0_i32_0 : i32, i32, i32
  }
}

</mosaic_0001>

<bundles_post_ra>
// kernel: rnnt_loss.1
= control target key start
LH: loop header
LB: loop body
LE: loop exit
PB: predicated region body
PF: predicated region fallthrough
CT: control target
= control target key end

     0   :  { %s1376_s0 = inlined_call_operand.vmem [shape: s32[2], index: 0, kind: input, shape index: {}]   ;;  %s1377_s3 = inlined_call_operand.vmem [shape: f32[2,8,8,128], index: 3, kind: input, shape index: {}]   ;;  %s1378_s4 = inlined_call_operand.vmem [shape: f32[2,8,128], index: 4, kind: output, shape index: {}]   ;;  %s1379_s1 = inlined_call_operand.vmem [shape: s32[2], index: 1, kind: input, shape index: {}]   ;;  %s1380_s2 = inlined_call_operand.vmem [shape: s32[2,4], index: 2, kind: input, shape index: {}]  }
   0x1   :  { %s9_s17 = sshll.u32 %s1376_s0, 4  ;;  %s13_s20 = sshll.u32 %s1379_s1, 4  ;;  %s10_s17 = int_to_ptr.vmem [resolvable:$true] %s9_s17  ;;  %s14_s20 = int_to_ptr.vmem [resolvable:$true] %s13_s20 }
   0x2   :  { %s908_s21 = scalar_lea.vmem %s10_s17, 16  ;;  %p913_p1 = scmp.lt.s32.totalorder %s10_s17, %s10_s17 }
   0x3   :  { %p909_p0 = scmp.ne.s32.totalorder %s10_s17, %s908_s21  ;;  %p914_p2 = scmp.lt.s32.totalorder %s908_s21, %s908_s21 }
   0x5   :  { %p915_p3 = por %p914_p2, %p913_p1 }
   0x7   :  { %p916_p4 = pnand %p915_p3, %p909_p0 }
   0x9   :  { %919 = shalt.err (!%p916_p4)  }
   0xa   :  { %s1010_s22 = smov [#allocation5]   ;;  %s920_s23 = scalar_lea.vmem %s14_s20, 16 }
   0xb   :  { %12 = dma.vmem_to_smem %s10_s17, 16, %s1010_s22, [#allocation4] }
   0xc   :  { %p921_p5 = scmp.ne.s32.totalorder %s14_s20, %s920_s23  ;;  %p925_p6 = scmp.lt.s32.totalorder %s14_s20, %s14_s20 }
   0xd   :  { %p926_p7 = scmp.lt.s32.totalorder %s920_s23, %s920_s23 }
   0xf   :  { %p927_p8 = por %p926_p7, %p925_p6 }
  0x11   :  { %p928_p9 = pnand %p927_p8, %p921_p5 }
  0x13   :  { %931 = shalt.err (!%p928_p9)  }
  0x14   :  { %s1011_s0 = smov [#allocation6]   ;;  %s17_s25 = sshll.u32 %s1380_s2, 4  ;;  %s18_s25 = int_to_ptr.vmem [resolvable:$true] %s17_s25 }
  0x15   :  { %16 = dma.vmem_to_smem %s14_s20, 16, %s1011_s0, [#allocation4] }
  0x16   :  { %s932_s26 = scalar_lea.vmem %s18_s25, 32  ;;  %p937_p11 = scmp.lt.s32.totalorder %s18_s25, %s18_s25 }
  0x17   :  { %p933_p10 = scmp.ne.s32.totalorder %s18_s25, %s932_s26  ;;  %p938_p12 = scmp.lt.s32.totalorder %s932_s26, %s932_s26 }
  0x19   :  { %p939_p13 = por %p938_p12, %p937_p11 }
  0x1b   :  { %p940_p0 = pnand %p939_p13, %p933_p10 }
  0x1d   :  { %943 = shalt.err (!%p940_p0)  }
  0x1e   :  { %s1012_s27 = smov [#allocation7]  }
  0x1f   :  { %20 = dma.vmem_to_smem %s18_s25, 32, %s1012_s27, [#allocation4] }
  0x20   :  { %976 = dma.done.wait [#allocation4], 64 }
  0x21   :  { %977 = vsyncadd [#allocation4], 4294967232 }
  0x22   :  { %22 = sfence }
  0x23   :  { %s1063_s28 = smov 0   ;;  %s1065_s29 = smov 0  }
  0x24   :  { %s1067_s30 = smov 0  }
  0x25 LB: > { %s40_s2 = sadd.s32 1, %s984_s29  ;;  %p737_p1 = scmp.ge.s32.totalorder %s988_s30, 1  ;;  %s988_s30 = sphi %s1067_s30, %s28_s30   ;;  %s984_s29 = sphi %s1065_s29, %s1387_s29   ;;  %s980_s28 = sphi %s1063_s28, %s1386_s28  }
  0x26   : > { %p42_p2 = scmp.ge.s32.totalorder %s40_s2, 2  ;;  %p123_p3 = scmp.lt.s32.totalorder %s988_s30, 3 }
  0x28   : > { %s1389_s2 = smov (%p42_p2, %s40_s2), 0  ;;  %p124_p4 = pnand %p737_p1, %p123_p3 }
  0x29   : > { %p147_p5 = scmp.lt.s32.totalorder (!%p124_p4), %s980_s28, 1  ;;  %s1122_s14 = sshll.u32 (!%p124_p4), %s980_s28, 7  ;;  %v262_v12 = vlaneseq (!%p124_p4)  ;;  %v1013_v60 = vmov (!%p124_p4), -1e+30   ;;  %vm386_vm5 = vcmask (!%p124_p4), 1041409   ;;  %vm388_vm6 = vcmask (!%p124_p4), 1042434  }
  0x2a   : > { %127 = sbr.rel (%p124_p4) target bundleno = 2631 (0xa47), region = 24  ;;  %s1129_s15 = sld [smem:[#allocation7 + %s1122_s14]] (!%p124_p4)  ;;  %165 = vst [vmem:[#allocation3] sm:$0xff] (!%p124_p4), %v1013_v60  ;;  %164 = vst [vmem:[#allocation2] sm:$0xff] (!%p124_p4), %v1013_v60  ;;  %vm390_vm7 = vcmask (!%p124_p4), 1043459   ;;  %vm392_vm8 = vcmask (!%p124_p4), 1044484  }
  0x2b   : > { %s270_s16 = sadd.s32 (!%p124_p4), 1, %s1122_s14  ;;  %v1140_v19 = vshrl.u32 (!%p124_p4), %v262_v12, 7  ;;  %s275_s18 = sadd.s32 (!%p124_p4), 2, %s1122_s14  ;;  %v1168_v45 = vand.u32 (!%p124_p4), 127, %v262_v12  ;;  %vm394_vm9 = vcmask (!%p124_p4), 1045509   ;;  %vm396_vm10 = vcmask (!%p124_p4), 1046534  }
  0x2c   : > { %s1142_s17 = sld [smem:[#allocation7 + %s270_s16]] (!%p124_p4)  ;;  %s280_s20 = sadd.s32 (!%p124_p4), 3, %s1122_s14  ;;  %vm398_vm11 = vcmask (!%p124_p4), 1047559   ;;  %vm402_vm12 = vcmask (!%p124_p4), 64512  }
  0x2d   : > { %s276_s19 = sld [smem:[#allocation7 + %s275_s18]] (!%p124_p4)  ;;  %vm264_vm0 = vcmp.eq.s32.totalorder (!%p124_p4), %v1140_v19, 0  ;;  %vm269_vm1 = vcmp.eq.s32.totalorder (!%p124_p4), %v1140_v19, 1  ;;  %vm274_vm2 = vcmp.eq.s32.totalorder (!%p124_p4), %v1140_v19, 2  ;;  %vm279_vm3 = vcmp.eq.s32.totalorder (!%p124_p4), %v1140_v19, 3  ;;  %s1014_s22 = smov (!%p124_p4), 1  }
  0x2e   : > { %s281_s21 = sld [smem:[#allocation7 + %s280_s20]] (!%p124_p4)  ;;  %vm460_vm13 = vcmp.ge.s32.totalorder (!%p124_p4), %v1168_v45, 1  ;;  %s1015_s23 = smov (!%p124_p4), 2   ;;  %vm468_vm14 = vcmp.ge.s32.totalorder (!%p124_p4), %v1168_v45, 2  ;;  %vm473_vm15 = vcmp.ge.s32.totalorder (!%p124_p4), %v1168_v45, 4 }
  0x2f   : > { %s1016_s0 = smov (!%p124_p4), 4   ;;  %s1018_s1 = smov (!%p124_p4), 8  }
  0x30   : > { %v267_v28 = vstv (!%p124_p4), %s1129_s15  ;;  %s1019_s24 = smov (!%p124_p4), 16   ;;  %s1020_s25 = smov (!%p124_p4), 32  }
  0x31   : > { %s148_s5 = scalar_select %p147_p5, %s980_s28, 1  ;;  %v268_v33 = vsel %vm264_vm0, %v267_v28, 0  ;;  %vm478_vm0 = vcmp.ge.s32.totalorder %v1168_v45, 8 }
  0x32   : > { %v272_v34 = vstv %s1142_s17  ;;  %s1021_s26 = smov 64   ;;  %s1284_s27 = sld [smem:[#allocation6 + %s980_s28]] }
  0x33   : > { %s746_s6 = sshll.u32 %s148_s5, 6  ;;  %s740_s7 = sshll.u32 %s148_s5, 3  ;;  %v273_v39 = vsel %vm269_vm1, %v272_v34, %v268_v33  ;;  %v277_v40 = vstv %s276_s19  ;;  %vm483_vm1 = vcmp.ge.s32.totalorder %v1168_v45, 16 }
  0x34   : > { %s154_s10 = scalar_lea.vmem %s1377_s3, %s746_s6  ;;  %s1091_s13 = scalar_lea.vmem %s1378_s4, %s740_s7  ;;  %v278_v42 = vsel %vm274_vm2, %v277_v40, %v273_v39  ;;  %v282_v43 = vstv %s281_s21  ;;  %vm488_vm2 = vcmp.ge.s32.totalorder %v1168_v45, 32 }
  0x35   : > { %v1093_v0 = vld [vmem:[%s154_s10] sm:$0xff]  ;;  %v1095_v1 = vld [vmem:[%s154_s10 + $0x10] sm:$0xff]  ;;  %v1099_v2 = vld [vmem:[%s154_s10 + $0x8] sm:$0xff]  ;;  %v283_v47 = vsel %vm279_vm3, %v282_v43, %v278_v42  ;;  %s1303_s5 = sld [smem:[#allocation5 + %s980_s28]]  ;;  %vm493_vm3 = vcmp.ge.s32.totalorder %v1168_v45, 64 }
  0x36   : > { %174 = vmax.xlane.f32.xlu0 %v1093_v0  ;;  %178 = vmax.xlane.f32.xlu1 %v1095_v1  ;;  %v1101_v3 = vld [vmem:[%s154_s10 + $0x18] sm:$0xff]  ;;  %v1105_v4 = vld [vmem:[%s154_s10 + $0x20] sm:$0xff]  ;;  %v1107_v5 = vld [vmem:[%s154_s10 + $0x28] sm:$0xff]  ;;  %vm1171_vm4 = vcmp.eq.s32.totalorder %v1168_v45, %v283_v47 }
  0x37   : > { %v1111_v6 = vld [vmem:[%s154_s10 + $0x30] sm:$0xff]  ;;  %v1113_v7 = vld [vmem:[%s154_s10 + $0x38] sm:$0xff]  ;;  %v289_v52 = vsel %vm1171_vm4, %v1093_v0, 0.0  ;;  %v290_v53 = vsel %vm1171_vm4, %v1099_v2, 0.0  ;;  %v291_v54 = vsel %vm1171_vm4, %v1095_v1, 0.0  ;;  %v292_v55 = vsel %vm1171_vm4, %v1101_v3, 0.0 }
  0x38   : > { %v293_v56 = vsel %vm1171_vm4, %v1105_v4, 0.0  ;;  %v294_v57 = vsel %vm1171_vm4, %v1107_v5, 0.0  ;;  %v295_v58 = vsel %vm1171_vm4, %v1111_v6, 0.0  ;;  %v296_v59 = vsel %vm1171_vm4, %v1113_v7, 0.0 }
  0x3a   : > { %176 = vmax.xlane.f32.xlu0 %v1099_v2  ;;  %180 = vmax.xlane.f32.xlu1 %v1101_v3 }
  0x3b   : > { %p501_p6 = scmp.eq.s32.totalorder %s1303_s5, 1  ;;  %p742_p7 = scmp.le.s32.totalorder %s1303_s5, 1 }
  0x3c   : > { %s1318_s28 = smov (!%p742_p7), 1  }
  0x3d   : > { %s503_s6 = scalar_select %p501_p6, 1, 0 }
  0x3e   : > { %182 = vmax.xlane.f32.xlu0 %v1105_v4  ;;  %184 = vmax.xlane.f32.xlu1 %v1107_v5 }
  0x42   : > { %186 = vmax.xlane.f32.xlu0 %v1111_v6  ;;  %188 = vmax.xlane.f32.xlu1 %v1113_v7 }
  0xc3   : > { %v1117_v8 = vpop.xlane.xlu0 %174  ;;  %v1119_v9 = vpop.xlane.xlu1 %178 }
  0xc4   : > { %v190_v10 = vsub.f32 %v1093_v0, %v1117_v8  ;;  %v192_v11 = vsub.f32 %v1095_v1, %v1119_v9 }
  0xc6   : > { %v198_v13 = vmul.f32 1.442695, %v190_v10  ;;  %v202_v14 = vmul.f32 1.442695, %v192_v11 }
  0xc7   : > { %v1132_v15 = vpop.xlane.xlu0 %176  ;;  %v1134_v16 = vpop.xlane.xlu1 %180 }
  0xc8   : > { %834 = vpow2.f32 %v198_v13  ;;  %v191_v17 = vsub.f32 %v1099_v2, %v1132_v15  ;;  %v193_v18 = vsub.f32 %v1101_v3, %v1134_v16 }
  0xc9   : > { %836 = vpow2.f32 %v202_v14 }
  0xca   : > { %v200_v20 = vmul.f32 1.442695, %v191_v17  ;;  %v204_v21 = vmul.f32 1.442695, %v193_v18 }
  0xcb   : > { %v1145_v22 = vpop.xlane.xlu0 %182  ;;  %v1147_v23 = vpop.xlane.xlu1 %184 }
  0xcc   : > { %838 = vpow2.f32 %v200_v20  ;;  %v194_v24 = vsub.f32 %v1105_v4, %v1145_v22  ;;  %v195_v25 = vsub.f32 %v1107_v5, %v1147_v23 }
  0xcd   : > { %840 = vpow2.f32 %v204_v21 }
  0xce   : > { %v206_v26 = vmul.f32 1.442695, %v194_v24  ;;  %v208_v27 = vmul.f32 1.442695, %v195_v25 }
  0xcf   : > { %v1156_v29 = vpop.xlane.xlu0 %186  ;;  %v1158_v30 = vpop.xlane.xlu1 %188 }
  0xd0   : > { %842 = vpow2.f32 %v206_v26  ;;  %v196_v31 = vsub.f32 %v1111_v6, %v1156_v29  ;;  %v197_v32 = vsub.f32 %v1113_v7, %v1158_v30 }
  0xd1   : > { %844 = vpow2.f32 %v208_v27 }
  0xd2   : > { %v835_v35 = vpop.eup %834  ;;  %v210_v36 = vmul.f32 1.442695, %v196_v31  ;;  %v212_v37 = vmul.f32 1.442695, %v197_v32  ;;  %v1207_v32 = vsub.s32 %v1168_v45, %v1140_v19 }
  0xd3   : > { %214 = vadd.xlane.f32.xlu0 %v835_v35  ;;  %v837_v38 = vpop.eup %836 }
  0xd4   : > { %846 = vpow2.f32 %v210_v36 }
  0xd5   : > { %848 = vpow2.f32 %v212_v37 }
  0xd6   : > { %v839_v41 = vpop.eup %838 }
  0xd7   : > { %218 = vadd.xlane.f32.xlu0 %v837_v38  ;;  %216 = vadd.xlane.f32.xlu1 %v839_v41  ;;  %v841_v44 = vpop.eup %840 }
  0xda   : > { %v843_v46 = vpop.eup %842 }
  0xdb   : > { %220 = vadd.xlane.f32.xlu1 %v841_v44  ;;  %222 = vadd.xlane.f32.xlu0 %v843_v46  ;;  %v845_v48 = vpop.eup %844 }
  0xde   : > { %v847_v50 = vpop.eup %846 }
  0xdf   : > { %224 = vadd.xlane.f32.xlu1 %v845_v48  ;;  %226 = vadd.xlane.f32.xlu0 %v847_v50  ;;  %v849_v51 = vpop.eup %848 }
  0xe3   : > { %228 = vadd.xlane.f32.xlu1 %v849_v51  ;;  %297 = vadd.xlane.f32.xlu0 %v289_v52 }
  0xe7   : > { %299 = vadd.xlane.f32.xlu1 %v290_v53  ;;  %301 = vadd.xlane.f32.xlu0 %v291_v54 }
  0xeb   : > { %303 = vadd.xlane.f32.xlu1 %v292_v55  ;;  %305 = vadd.xlane.f32.xlu0 %v293_v56 }
  0xef   : > { %307 = vadd.xlane.f32.xlu1 %v294_v57  ;;  %309 = vadd.xlane.f32.xlu0 %v295_v58 }
  0xf3   : > { %311 = vadd.xlane.f32.xlu1 %v296_v59 }
 0x160   : > { %v215_v61 = vpop.xlane.xlu0 %214 }
 0x161   : > { %850 = vlog2.f32 %v215_v61 }
 0x164   : > { %v217_v62 = vpop.xlane.xlu1 %216  ;;  %v219_v63 = vpop.xlane.xlu0 %218 }
 0x165   : > { %852 = vlog2.f32 %v217_v62 }
 0x166   : > { %854 = vlog2.f32 %v219_v63 }
 0x168   : > { %v221_v10 = vpop.xlane.xlu1 %220  ;;  %v223_v11 = vpop.xlane.xlu0 %222 }
 0x169   : > { %856 = vlog2.f32 %v221_v10 }
 0x16a   : > { %858 = vlog2.f32 %v223_v11 }
 0x16b   : > { %v851_v12 = vpop.eup %850 }
 0x16c   : > { %v231_v13 = vmul.f32 0.6931472, %v851_v12  ;;  %v225_v14 = vpop.xlane.xlu1 %224  ;;  %v227_v17 = vpop.xlane.xlu0 %226 }
 0x16d   : > { %860 = vlog2.f32 %v225_v14 }
 0x16e   : > { %862 = vlog2.f32 %v227_v17  ;;  %v1200_v20 = vadd.f32 %v231_v13, %v1117_v8 }
 0x16f   : > { %v853_v18 = vpop.eup %852 }
 0x170   : > { %v855_v21 = vpop.eup %854  ;;  %v233_v24 = vmul.f32 0.6931472, %v853_v18  ;;  %v229_v25 = vpop.xlane.xlu1 %228 }
 0x171   : > { %v298_v26 = vpop.xlane.xlu0 %297  ;;  %v235_v27 = vmul.f32 0.6931472, %v855_v21  ;;  %864 = vlog2.f32 %v229_v25 }
 0x172   : > { %v1203_v28 = vadd.f32 %v233_v24, %v1132_v15  ;;  %v313_v33 = vsub.f32 %v298_v26, %v1200_v20 }
 0x173   : > { %v857_v31 = vpop.eup %856  ;;  %v1211_v34 = vadd.f32 %v235_v27, %v1119_v9 }
 0x174   : > { %v859_v8 = vpop.eup %858  ;;  %v237_v35 = vmul.f32 0.6931472, %v857_v31  ;;  %v300_v36 = vpop.xlane.xlu1 %299  ;;  %v415_v41 = vrot.slane %v313_v33, %v1207_v32 }
 0x175   : > { %v302_v37 = vpop.xlane.xlu0 %301  ;;  %v239_v38 = vmul.f32 0.6931472, %v859_v8  ;;  %v314_v39 = vsub.f32 %v300_v36, %v1203_v28 }
 0x176   : > { %v315_v15 = vsub.f32 %v302_v37, %v1211_v34  ;;  %v1216_v40 = vadd.f32 %v237_v35, %v1134_v16  ;;  %v1017_v35 = vmov 0  }
 0x177   : > { %v861_v19 = vpop.eup %860  ;;  %v419_v42 = vrot.slane %v314_v39, %v1207_v32  ;;  %v1221_v9 = vadd.f32 %v239_v38, %v1145_v22  ;;  %832 = vset.pattern.permute.xlu1 %v1017_v35  ;;  %833 = vset.pattern.permute.xlu0 %v1017_v35 }
 0x178   : > { %v863_v43 = vpop.eup %862  ;;  %v241_v44 = vmul.f32 0.6931472, %v861_v19  ;;  %v423_v46 = vrot.slane %v315_v15, %v1207_v32  ;;  %v304_v47 = vpop.xlane.xlu1 %303 }
 0x179   : > { %v306_v48 = vpop.xlane.xlu0 %305  ;;  %v243_v49 = vmul.f32 0.6931472, %v863_v43  ;;  %v444_v50 = vsel %vm386_vm5, %v419_v42, %v415_v41  ;;  %v316_v16 = vsub.f32 %v304_v47, %v1216_v40  ;;  %v254_v41 = vsub.f32 %v1093_v0, %v1200_v20 }
 0x17a   : > { %v317_v51 = vsub.f32 %v306_v48, %v1221_v9  ;;  %v1228_v52 = vadd.f32 %v241_v44, %v1147_v23  ;;  %v445_v56 = vsel %vm388_vm6, %v423_v46, %v444_v50  ;;  %v256_v42 = vsub.f32 %v1095_v1, %v1211_v34 }
 0x17b   : > { %v865_v22 = vpop.eup %864  ;;  %v427_v53 = vrot.slane %v316_v16, %v1207_v32  ;;  %v1232_v54 = vadd.f32 %v243_v49, %v1156_v29  ;;  %v257_v43 = vsub.f32 %v1101_v3, %v1216_v40  ;;  %v255_v1 = vsub.f32 %v1099_v2, %v1203_v28 }
 0x17c   : > { %v245_v55 = vmul.f32 0.6931472, %v865_v22  ;;  %v431_v57 = vrot.slane %v317_v51, %v1207_v32  ;;  %v308_v58 = vpop.xlane.xlu1 %307  ;;  %v259_v44 = vsub.f32 %v1107_v5, %v1228_v52  ;;  %v258_v3 = vsub.f32 %v1105_v4, %v1221_v9 }
 0x17d   : > { %v310_v59 = vpop.xlane.xlu0 %309  ;;  %v446_v60 = vsel %vm390_vm7, %v427_v53, %v445_v56  ;;  %v318_v61 = vsub.f32 %v308_v58, %v1228_v52  ;;  %v260_v5 = vsub.f32 %v1111_v6, %v1232_v54 }
 0x17e   : > { %v319_v23 = vsub.f32 %v310_v59, %v1232_v54  ;;  %v253_v62 = vadd.f32 %v245_v55, %v1158_v30  ;;  %v447_v63 = vsel %vm392_vm8, %v431_v57, %v446_v60 }
 0x17f   : > { %v435_v29 = vrot.slane %v318_v61, %v1207_v32 }
 0x180   : > { %v439_v10 = vrot.slane %v319_v23, %v1207_v32  ;;  %v312_v11 = vpop.xlane.xlu1 %311  ;;  %v261_v46 = vsub.f32 %v1113_v7, %v253_v62 }
 0x181   : > { %v448_v12 = vsel %vm394_vm9, %v435_v29, %v447_v63  ;;  %v320_v13 = vsub.f32 %v312_v11, %v253_v62 }
 0x182   : > { %v449_v17 = vsel %vm396_vm10, %v439_v10, %v448_v12 }
 0x183   : > { %v443_v14 = vrot.slane %v320_v13, %v1207_v32 }
 0x185   : > { %v450_v18 = vsel %vm398_vm11, %v443_v14, %v449_v17 }
 0x186   : > { %453 = vst.msk [vmem:[#allocation3] sm:$0xff] %vm402_vm12, %v450_v18 }
 0x18d   : > { %v459_v30 = vld [vmem:[#allocation3] sm:$0xff] }
 0x18e   : > { %461 = vrot.lane.b32.xlu0 %v459_v30, %s1014_s22 }
 0x200   : > { %v462_v21 = vpop.permute.xlu0 %461 }
 0x201   : > { %v463_v24 = vsel %vm460_vm13, %v462_v21, 0.0 }
 0x202   : > { %464 = vrot.lane.b32.xlu1 %v463_v24, %s1014_s22 }
 0x274   : > { %v465_v25 = vpop.permute.xlu1 %464 }
 0x275   : > { %v466_v26 = vsel %vm460_vm13, %v465_v25, 0.0 }
 0x276   : > { %v467_v27 = vadd.f32 %v466_v26, %v463_v24 }
 0x278   : > { %469 = vrot.lane.b32.xlu1 %v467_v27, %s1015_s23 }
 0x2ea   : > { %v470_v31 = vpop.permute.xlu1 %469 }
 0x2eb   : > { %v471_v33 = vsel %vm468_vm14, %v470_v31, 0.0 }
 0x2ec   : > { %v472_v8 = vadd.f32 %v471_v33, %v467_v27 }
 0x2ee   : > { %474 = vrot.lane.b32.xlu1 %v472_v8, %s1016_s0 }
 0x360   : > { %v475_v36 = vpop.permute.xlu1 %474 }
 0x361   : > { %v476_v37 = vsel %vm473_vm15, %v475_v36, 0.0 }
 0x362   : > { %v477_v38 = vadd.f32 %v476_v37, %v472_v8 }
 0x364   : > { %479 = vrot.lane.b32.xlu0 %v477_v38, %s1018_s1 }
 0x3d6   : > { %v480_v39 = vpop.permute.xlu0 %479 }
 0x3d7   : > { %v481_v15 = vsel %vm478_vm0, %v480_v39, 0.0 }
 0x3d8   : > { %v482_v19 = vadd.f32 %v481_v15, %v477_v38 }
 0x3da   : > { %484 = vrot.lane.b32.xlu1 %v482_v19, %s1019_s24 }
 0x3de   : > { %331 = vperm.xlu1 %832, %v254_v41  }
 0x3e2   : > { %337 = vperm.xlu1 %832, %v256_v42  }
 0x3e6   : > { %340 = vperm.xlu1 %832, %v257_v43  }
 0x3ea   : > { %346 = vperm.xlu1 %832, %v259_v44  }
 0x3ee   : > { %352 = vperm.xlu1 %832, %v261_v46  }
 0x44c   : > { %v485_v47 = vpop.permute.xlu1 %484 }
 0x44d   : > { %v486_v0 = vsel %vm483_vm1, %v485_v47, 0.0 }
 0x44e   : > { %v487_v20 = vadd.f32 %v486_v0, %v482_v19 }
 0x450   : > { %489 = vrot.lane.b32.xlu0 %v487_v20, %s1020_s25 }
 0x454   : > { %334 = vperm.xlu0 %833, %v255_v1  }
 0x458   : > { %343 = vperm.xlu0 %833, %v258_v3  }
 0x45c   : > { %349 = vperm.xlu0 %833, %v260_v5  }
 0x45d   : > { %v332_v7 = vpop.permute.xlu1 %331 }
 0x45e   : > { %v357_v9 = vrot.slane %v332_v7, %v1207_v32 }
 0x461   : > { %v338_v2 = vpop.permute.xlu1 %337 }
 0x462   : > { %v365_v50 = vrot.slane %v338_v2, %v1207_v32 }
 0x465   : > { %v341_v28 = vpop.permute.xlu1 %340 }
 0x466   : > { %v369_v16 = vrot.slane %v341_v28, %v1207_v32 }
 0x469   : > { %v347_v49 = vpop.permute.xlu1 %346 }
 0x46a   : > { %v377_v57 = vrot.slane %v347_v49, %v1207_v32 }
 0x46d   : > { %v353_v55 = vpop.permute.xlu1 %352 }
 0x46e   : > { %v385_v60 = vrot.slane %v353_v55, %v1207_v32 }
 0x4c2   : > { %v490_v34 = vpop.permute.xlu0 %489 }
 0x4c3   : > { %v491_v40 = vsel %vm488_vm2, %v490_v34, 0.0 }
 0x4c4   : > { %v492_v48 = vadd.f32 %v491_v40, %v487_v20 }
 0x4c6   : > { %494 = vrot.lane.b32.xlu0 %v492_v48, %s1021_s26 }
 0x4d3   : > { %v335_v4 = vpop.permute.xlu0 %334 }
 0x4d4   : > { %v361_v6 = vrot.slane %v335_v4, %v1207_v32 }
 0x4d6   : > { %v387_v51 = vsel %vm386_vm5, %v361_v6, %v357_v9 }
 0x4d7   : > { %v389_v52 = vsel %vm388_vm6, %v365_v50, %v387_v51  ;;  %v344_v22 = vpop.permute.xlu0 %343 }
 0x4d8   : > { %v373_v53 = vrot.slane %v344_v22, %v1207_v32  ;;  %v391_v54 = vsel %vm390_vm7, %v369_v16, %v389_v52 }
 0x4da   : > { %v393_v56 = vsel %vm392_vm8, %v373_v53, %v391_v54 }
 0x4db   : > { %v350_v58 = vpop.permute.xlu0 %349  ;;  %v395_v61 = vsel %vm394_vm9, %v377_v57, %v393_v56 }
 0x4dc   : > { %v381_v59 = vrot.slane %v350_v58, %v1207_v32  ;;  %v504_v32 = vstv %s503_s6 }
 0x4dd   : > { %vm505_vm4 = vcmp.eq.s32.totalorder %v504_v32, 1 }
 0x4de   : > { %v397_v23 = vsel %vm396_vm10, %v381_v59, %v395_v61 }
 0x4df   : > { %v399_v62 = vsel %vm398_vm11, %v385_v60, %v397_v23 }
 0x4e0   : > { %403 = vst.msk [vmem:[#allocation2] sm:$0xff] %vm402_vm12, %v399_v62 }
 0x4e7   : > { %v500_v12 = vld [vmem:[#allocation2] sm:$0x1]  }
 0x538   : > { %v495_v29 = vpop.permute.xlu0 %494 }
 0x539   : > { %v496_v63 = vsel %vm493_vm3, %v495_v29, 0.0 }
 0x53a   : > { %v497_v10 = vadd.f32 %v496_v63, %v492_v48 }
 0x53c   : > { %498 = vst [vmem:[#allocation3] sm:$0xff] %v497_v10 }
 0x541   : > { %696 = sbr.rel (%p742_p7) target bundleno = 2419 (0x973), region = 67 }
 0x543   : > { %v499_v11 = vld [vmem:[#allocation3] sm:$0x1]  }
 0x544   : > { %v502_v13 = vadd.f32 %v500_v12, %v499_v11 }
 0x546   : > { %v506_v14 = vsel %vm505_vm4, %v502_v13, -1e+30  }
 0x547   : > { %v1383_v17 = vmov %v506_v14 }
 0x548 LB: >> { %v520_v18 = vadd.f32 %v996_v12, %v1000_v11  ;;  %s518_s7 = scalar_lea.vmem [#allocation3], %s1004_s28  ;;  %s1022_s8 = smov 1   ;;  %s1004_s28 = sphi %s1318_s28, %s510_s28   ;;  %v1000_v11 = vphi %v499_v11, %v620_v11   ;;  %v996_v12 = vphi %v500_v12, %v517_v12   ;;  %v992_v14 = vphi %v506_v14, %v1384_v14  }
 0x549   : >> { %v1329_v30 = vld [vmem:[%s518_s7] sm:$0x1]  ;;  %s1023_s9 = smov 2   ;;  %s1024_s10 = smov 4  }
 0x54a   : >> { %v521_v21 = vsub.f32 %v520_v18, %v1329_v30  ;;  %s1025_s11 = smov 8   ;;  %s1026_s12 = smov 16  }
 0x54b   : >> { %s1027_s14 = smov 32   ;;  %s1028_s15 = smov 64  }
 0x54c   : >> { %522 = vrot.lane.b32.xlu0 %v521_v21, %s1022_s8  ;;  %s743_s16 = sadd.s32 4294967295, %s1303_s5  ;;  %s516_s18 = scalar_lea.vmem [#allocation2], %s1004_s28 }
 0x54d   : >> { %p622_p8 = scmp.eq.s32.totalorder %s1004_s28, %s743_s16  ;;  %s510_s28 = sadd.s32 1, %s1004_s28  }
 0x54e   : >> { %p509_p9 = scmp.ge.s32.totalorder %s510_s28, %s1303_s5 }
 0x54f   : >> { %s624_s17 = scalar_select %p622_p8, 1, 0 }
 0x5be   : >> { %v523_v24 = vpop.permute.xlu0 %522 }
 0x5bf   : >> { %v524_v25 = vsel %vm460_vm13, %v523_v24, -1e+30 }
 0x5c0   : >> { %v525_v26 = vmax.f32 %v521_v21, %v524_v25 }
 0x5c2   : >> { %v526_v27 = vsub.f32 %v521_v21, %v525_v26  ;;  %v529_v31 = vsub.f32 %v524_v25, %v525_v26 }
 0x5c4   : >> { %v527_v33 = vmul.f32 1.442695, %v526_v27  ;;  %v530_v8 = vmul.f32 1.442695, %v529_v31 }
 0x5c6   : >> { %866 = vpow2.f32 %v527_v33 }
 0x5c7   : >> { %868 = vpow2.f32 %v530_v8 }
 0x5d0   : >> { %v867_v35 = vpop.eup %866 }
 0x5d1   : >> { %v869_v36 = vpop.eup %868 }
 0x5d2   : >> { %v532_v37 = vadd.f32 %v869_v36, %v867_v35 }
 0x5d4   : >> { %870 = vlog2.f32 %v532_v37 }
 0x5de   : >> { %v871_v38 = vpop.eup %870 }
 0x5df   : >> { %v534_v39 = vmul.f32 0.6931472, %v871_v38 }
 0x5e1   : >> { %v535_v15 = vadd.f32 %v534_v39, %v525_v26 }
 0x5e3   : >> { %536 = vrot.lane.b32.xlu0 %v535_v15, %s1023_s9 }
 0x655   : >> { %v537_v19 = vpop.permute.xlu0 %536 }
 0x656   : >> { %v538_v41 = vsel %vm468_vm14, %v537_v19, -1e+30 }
 0x657   : >> { %v539_v42 = vmax.f32 %v535_v15, %v538_v41 }
 0x659   : >> { %v540_v43 = vsub.f32 %v535_v15, %v539_v42  ;;  %v543_v44 = vsub.f32 %v538_v41, %v539_v42 }
 0x65b   : >> { %v541_v46 = vmul.f32 1.442695, %v540_v43  ;;  %v544_v47 = vmul.f32 1.442695, %v543_v44 }
 0x65d   : >> { %872 = vpow2.f32 %v541_v46 }
 0x65e   : >> { %874 = vpow2.f32 %v544_v47 }
 0x667   : >> { %v873_v0 = vpop.eup %872 }
 0x668   : >> { %v875_v20 = vpop.eup %874 }
 0x669   : >> { %v546_v1 = vadd.f32 %v875_v20, %v873_v0 }
 0x66b   : >> { %876 = vlog2.f32 %v546_v1 }
 0x675   : >> { %v877_v3 = vpop.eup %876 }
 0x676   : >> { %v548_v5 = vmul.f32 0.6931472, %v877_v3 }
 0x678   : >> { %v549_v7 = vadd.f32 %v548_v5, %v539_v42 }
 0x67a   : >> { %550 = vrot.lane.b32.xlu1 %v549_v7, %s1024_s10 }
 0x6ec   : >> { %v551_v34 = vpop.permute.xlu1 %550 }
 0x6ed   : >> { %v552_v40 = vsel %vm473_vm15, %v551_v34, -1e+30 }
 0x6ee   : >> { %v553_v48 = vmax.f32 %v549_v7, %v552_v40 }
 0x6f0   : >> { %v554_v2 = vsub.f32 %v549_v7, %v553_v48  ;;  %v557_v28 = vsub.f32 %v552_v40, %v553_v48 }
 0x6f2   : >> { %v555_v4 = vmul.f32 1.442695, %v554_v2  ;;  %v558_v9 = vmul.f32 1.442695, %v557_v28  ;;  %v625_v2 = vstv %s624_s17 }
 0x6f3   : >> { %vm626_vm5 = vcmp.eq.s32.totalorder %v625_v2, 1 }
 0x6f4   : >> { %878 = vpow2.f32 %v555_v4 }
 0x6f5   : >> { %880 = vpow2.f32 %v558_v9 }
 0x6fe   : >> { %v879_v49 = vpop.eup %878 }
 0x6ff   : >> { %v881_v6 = vpop.eup %880 }
 0x700   : >> { %v560_v50 = vadd.f32 %v881_v6, %v879_v49 }
 0x702   : >> { %882 = vlog2.f32 %v560_v50 }
 0x70c   : >> { %v883_v16 = vpop.eup %882 }
 0x70d   : >> { %v562_v51 = vmul.f32 0.6931472, %v883_v16 }
 0x70f   : >> { %v563_v52 = vadd.f32 %v562_v51, %v553_v48 }
 0x711   : >> { %564 = vrot.lane.b32.xlu1 %v563_v52, %s1025_s11 }
 0x783   : >> { %v565_v22 = vpop.permute.xlu1 %564 }
 0x784   : >> { %v566_v53 = vsel %vm478_vm0, %v565_v22, -1e+30 }
 0x785   : >> { %v567_v54 = vmax.f32 %v563_v52, %v566_v53 }
 0x787   : >> { %v568_v55 = vsub.f32 %v563_v52, %v567_v54  ;;  %v571_v56 = vsub.f32 %v566_v53, %v567_v54 }
 0x789   : >> { %v569_v57 = vmul.f32 1.442695, %v568_v55  ;;  %v572_v58 = vmul.f32 1.442695, %v571_v56 }
 0x78b   : >> { %884 = vpow2.f32 %v569_v57 }
 0x78c   : >> { %886 = vpow2.f32 %v572_v58 }
 0x795   : >> { %v885_v59 = vpop.eup %884 }
 0x796   : >> { %v887_v60 = vpop.eup %886 }
 0x797   : >> { %v574_v61 = vadd.f32 %v887_v60, %v885_v59 }
 0x799   : >> { %888 = vlog2.f32 %v574_v61 }
 0x7a3   : >> { %v889_v23 = vpop.eup %888 }
 0x7a4   : >> { %v576_v62 = vmul.f32 0.6931472, %v889_v23 }
 0x7a6   : >> { %v577_v29 = vadd.f32 %v576_v62, %v567_v54 }
 0x7a8   : >> { %578 = vrot.lane.b32.xlu0 %v577_v29, %s1026_s12 }
 0x81a   : >> { %v579_v63 = vpop.permute.xlu0 %578 }
 0x81b   : >> { %v580_v10 = vsel %vm483_vm1, %v579_v63, -1e+30 }
 0x81c   : >> { %v581_v32 = vmax.f32 %v577_v29, %v580_v10 }
 0x81e   : >> { %v582_v11 = vsub.f32 %v577_v29, %v581_v32  ;;  %v585_v12 = vsub.f32 %v580_v10, %v581_v32 }
 0x820   : >> { %v583_v13 = vmul.f32 1.442695, %v582_v11  ;;  %v586_v17 = vmul.f32 1.442695, %v585_v12  ;;  %v517_v12 = vld [vmem:[%s516_s18] sm:$0x1]  }
 0x822   : >> { %890 = vpow2.f32 %v583_v13 }
 0x823   : >> { %892 = vpow2.f32 %v586_v17 }
 0x82c   : >> { %v891_v18 = vpop.eup %890 }
 0x82d   : >> { %v893_v21 = vpop.eup %892 }
 0x82e   : >> { %v588_v24 = vadd.f32 %v893_v21, %v891_v18 }
 0x830   : >> { %894 = vlog2.f32 %v588_v24 }
 0x83a   : >> { %v895_v25 = vpop.eup %894 }
 0x83b   : >> { %v590_v26 = vmul.f32 0.6931472, %v895_v25 }
 0x83d   : >> { %v591_v27 = vadd.f32 %v590_v26, %v581_v32 }
 0x83f   : >> { %592 = vrot.lane.b32.xlu1 %v591_v27, %s1027_s14 }
 0x8b1   : >> { %v593_v31 = vpop.permute.xlu1 %592 }
 0x8b2   : >> { %v594_v33 = vsel %vm488_vm2, %v593_v31, -1e+30 }
 0x8b3   : >> { %v595_v8 = vmax.f32 %v591_v27, %v594_v33 }
 0x8b5   : >> { %v596_v35 = vsub.f32 %v591_v27, %v595_v8  ;;  %v599_v36 = vsub.f32 %v594_v33, %v595_v8 }
 0x8b7   : >> { %v597_v37 = vmul.f32 1.442695, %v596_v35  ;;  %v600_v38 = vmul.f32 1.442695, %v599_v36 }
 0x8b9   : >> { %896 = vpow2.f32 %v597_v37 }
 0x8ba   : >> { %898 = vpow2.f32 %v600_v38 }
 0x8c3   : >> { %v897_v39 = vpop.eup %896 }
 0x8c4   : >> { %v899_v15 = vpop.eup %898 }
 0x8c5   : >> { %v602_v19 = vadd.f32 %v899_v15, %v897_v39 }
 0x8c7   : >> { %900 = vlog2.f32 %v602_v19 }
 0x8d1   : >> { %v901_v41 = vpop.eup %900 }
 0x8d2   : >> { %v604_v42 = vmul.f32 0.6931472, %v901_v41 }
 0x8d4   : >> { %v605_v43 = vadd.f32 %v604_v42, %v595_v8 }
 0x8d6   : >> { %606 = vrot.lane.b32.xlu0 %v605_v43, %s1028_s15 }
 0x948   : >> { %v607_v44 = vpop.permute.xlu0 %606 }
 0x949   : >> { %v608_v46 = vsel %vm493_vm3, %v607_v44, -1e+30 }
 0x94a   : >> { %v609_v47 = vmax.f32 %v605_v43, %v608_v46 }
 0x94c   : >> { %v610_v0 = vsub.f32 %v605_v43, %v609_v47  ;;  %v613_v20 = vsub.f32 %v608_v46, %v609_v47 }
 0x94e   : >> { %v611_v1 = vmul.f32 1.442695, %v610_v0  ;;  %v614_v3 = vmul.f32 1.442695, %v613_v20 }
 0x950   : >> { %902 = vpow2.f32 %v611_v1 }
 0x951   : >> { %904 = vpow2.f32 %v614_v3 }
 0x95a   : >> { %v903_v5 = vpop.eup %902 }
 0x95b   : >> { %v905_v7 = vpop.eup %904 }
 0x95c   : >> { %v616_v34 = vadd.f32 %v905_v7, %v903_v5 }
 0x95e   : >> { %906 = vlog2.f32 %v616_v34 }
 0x968   : >> { %v907_v40 = vpop.eup %906 }
 0x969   : >> { %v618_v48 = vmul.f32 0.6931472, %v907_v40 }
 0x96b   : >> { %v619_v28 = vadd.f32 %v618_v48, %v609_v47 }
 0x96c   : > { %512 = sbr.rel (!%p509_p9) target bundleno = 1352 (0x548), region = 73 }
 0x96d   : >> { %v620_v11 = vadd.f32 %v619_v28, %v1329_v30  }
 0x96f   : >> { %v623_v4 = vadd.f32 %v620_v11, %v517_v12 }
 0x971   : >> { %v627_v9 = vsel %vm626_vm5, %v623_v4, %v992_v14  }
 0x972   : >> { %v1384_v14 = vmov %v627_v9  ;;  %v1385_v17 = vmov (%p509_p9), %v627_v9 }
 0x973 PF: > { %v628_v30 = vstv %s1284_s27  ;;  %vm631_vm6 = vcmask 1040384   ;;  %v1008_v17 = vphi %v1383_v17, %v1385_v17  }
 0x974   : > { %vm629_vm7 = vcmp.eq.s32.totalorder %v1168_v45, %v628_v30 }
 0x975   : > { %v630_v49 = vsel %vm629_vm7, %v1008_v17, 0.0 }
 0x976   : > { %v632_v6 = vsel %vm631_vm6, %v630_v49, 0.0 }
 0x977   : > { %633 = vadd.xlane.f32.xlu0 %v632_v6 }
 0xa04   : > { %v634_v50 = vpop.xlane.xlu0 %633 }
 0xa05   : > { %v635_v16 = vrot.slane %v634_v50, 4 }
 0xa07   : > { %v636_v51 = vadd.f32 %v635_v16, %v634_v50 }
 0xa09   : > { %v637_v52 = vrot.slane %v636_v51, 2 }
 0xa0b   : > { %v638_v22 = vadd.f32 %v637_v52, %v636_v51 }
 0xa0d   : > { %v639_v14 = vrot.slane %v638_v22, 1 }
 0xa0f   : > { %v640_v53 = vadd.f32 %v639_v14, %v638_v22 }
 0xa11   : > { %747 = vpush %v640_v53 }
 0xa42   : > { %s748_s19 = spop %747 }
 0xa43   : > { %s642_s20 = ssub.f32 0.0, %s748_s19 }
 0xa45   : > { %v643_v54 = vstv %s642_s20 }
 0xa46   : > { %645 = vst [vmem:[%s1091_s13] sm:$0xff] %v643_v54 }
 0xa47 PF: > { %s28_s30 = sadd.s32 1, %s988_s30   ;;  %s1386_s28 = smov %s984_s29 }
 0xa48   : > { %p25_p10 = scmp.ge.s32.totalorder %s28_s30, 4   ;;  %s1387_s29 = smov %s1389_s2 }
 0xa4a   :  { %27 = sbr.rel (!%p25_p10) target bundleno = 37 (0x25), region = 84 }

</bundles_post_ra>
